<compile_context>
chip_gen: v7x
topology: tpu7x:2x2x1
jax: 0.10.0
libtpu: 0.0.40
codegen_flags: <defaults>
</compile_context>

<pallas_src>
import math
import functools

import jax
import jax.numpy as jnp
from jax import lax
from jax.experimental import pallas as pl
from jax.experimental.pallas import tpu as pltpu


def _attn_kernel(x_ref, wv_ref, bv_ref, wo_ref, bo_ref, out_ref, vkv_ref,
                 *, num_heads: int, scale: float, tq: int):
    """One grid step == one (batch element, query tile).

    x_ref  : (1, N, D_in)       full sequence of x for this batch element
    wv_ref : (D_in, D_v)        shared q=k=v projection weight, (in, out) layout
    bv_ref : (1, D_v)
    wo_ref : (H, d_head, D_in)  per-head o-projection (mean's 1/H pre-folded)
    bo_ref : (1, D_in)
    out_ref: (1, tq, D_in)
    vkv_ref: VMEM scratch (H, N, d_head) — shared q/k/v, head-major, cached per batch
    """
    qi = pl.program_id(1)
    H = num_heads
    dh = vkv_ref.shape[2]
    cdt = x_ref.dtype                      # compute dtype for MXU operands

    # --- shared q=k=v projection of the full sequence: once per batch element.
    @pl.when(qi == 0)
    def _():
        xk = x_ref[0]                                                 # (N, D_in)
        vk = jnp.dot(xk, wv_ref[...],
                     preferred_element_type=jnp.float32) + bv_ref[0]  # (N, D_v) f32
        for h in range(H):                                            # head-major store
            vkv_ref[h] = vk[:, h * dh:(h + 1) * dh].astype(cdt)

    row0 = pl.multiple_of(qi * tq, tq)                                # aligned tile start

    acc = jnp.zeros((tq, out_ref.shape[2]), jnp.float32)              # (tq, D_in)
    for h in range(H):                                                # static unroll over heads
        vk_h = vkv_ref[h]                                             # (N, dh)
        vq_h = vkv_ref[h, pl.ds(row0, tq), :]                         # (tq, dh) query rows
        # scores: contract last dims of both operands (no explicit transpose)
        s = lax.dot_general(vq_h, vk_h,
                            dimension_numbers=(((1,), (1,)), ((), ())),
                            preferred_element_type=jnp.float32) * scale
        m = jnp.max(s, axis=-1, keepdims=True)                        # stable softmax
        p = jnp.exp(s - m)
        l = jnp.sum(p, axis=-1, keepdims=True)
        o_h = jnp.dot(p.astype(cdt), vk_h,
                      preferred_element_type=jnp.float32)             # (tq, dh) f32
        o_h = o_h * pl.reciprocal(l, approx=True)                     # normalize post-matmul
        # head merge fused into the o-projection: acc += o_h @ wo[h]
        acc = acc + jnp.dot(o_h.astype(wo_ref.dtype), wo_ref[h],
                            preferred_element_type=jnp.float32)
    out_ref[0] = (acc + bo_ref[0]).astype(out_ref.dtype)


def _choose_q_tile(n: int) -> int:
    for t in (256, 128, 64, 32, 16, 8):
        if n >= t and n % t == 0:
            return t
    return n  # unaligned / tiny sequence: one full-extent tile


def shared_qkv_mhsa(x, wv, bv, wo, bo, *, num_heads: int, merge_type: str = 'concat'):
    """x: (B, N, D_in). Weights in (in, out) layout: y = x @ W + b.
    wo: (D_v, D_in) for 'concat', (D_v // num_heads, D_in) for 'mean'."""
    B, N, D_in = x.shape
    D_v = wv.shape[1]
    if D_v % num_heads != 0:
        raise ValueError(f"D_v={D_v} must be divisible by num_heads={num_heads}")
    if merge_type not in ('concat', 'mean'):
        raise ValueError(f"unknown merge_type {merge_type!r}")
    dh = D_v // num_heads

    bv2 = jnp.reshape(bv, (1, D_v))
    bo2 = jnp.reshape(bo, (1, D_in))

    if merge_type == 'mean':
        assert wo.shape == (dh, D_in), wo.shape
        # fold the 1/H of the head-mean into the (shared) o-projection weight
        wo3 = jnp.tile((wo / num_heads)[None, :, :], (num_heads, 1, 1))
    else:  # 'concat': rows of wo follow the 'b n (h d)' order -> (H, dh, D_in)
        assert wo.shape == (D_v, D_in), wo.shape
        wo3 = jnp.reshape(wo, (num_heads, dh, D_in))

    tq = _choose_q_tile(N)
    n_q = N // tq
    scale = 1.0 / math.sqrt(float(dh))

    kernel = functools.partial(_attn_kernel, num_heads=num_heads, scale=scale, tq=tq)

    nbytes = lambda a: int(a.size) * jnp.dtype(a.dtype).itemsize
    cost = pl.CostEstimate(
        flops=int(B * (2 * N * D_in * D_v + 4 * N * N * D_v + 2 * N * D_v * D_in)),
        transcendentals=int(B * num_heads * N * N),
        bytes_accessed=int(2 * nbytes(x) + nbytes(wv) + nbytes(wo3)
                           + nbytes(bv2) + nbytes(bo2)),
    )

    return pl.pallas_call(
        kernel,
        out_shape=jax.ShapeDtypeStruct((B, N, D_in), x.dtype),
        grid_spec=pltpu.PrefetchScalarGridSpec(
            num_scalar_prefetch=0,
            grid=(B, n_q),
            in_specs=[
                pl.BlockSpec((1, N, D_in), lambda b, q: (b, 0, 0)),           # x: full seq
                pl.BlockSpec((D_in, D_v), lambda b, q: (0, 0)),               # wv
                pl.BlockSpec((1, D_v), lambda b, q: (0, 0)),                  # bv
                pl.BlockSpec((num_heads, dh, D_in), lambda b, q: (0, 0, 0)),  # wo (per head)
                pl.BlockSpec((1, D_in), lambda b, q: (0, 0)),                 # bo
            ],
            out_specs=pl.BlockSpec((1, tq, D_in), lambda b, q: (b, q, 0)),
            scratch_shapes=[pltpu.VMEM((num_heads, N, dh), x.dtype)],         # cached q=k=v
        ),
        compiler_params=pltpu.CompilerParams(
            # batch axis shards across the two v7x TensorCores; the query-tile
            # axis is 'arbitrary' because the k/v scratch is reused across it.
            dimension_semantics=("parallel", "arbitrary"),
            vmem_limit_bytes=64 * 1024 * 1024,
        ),
        cost_estimate=cost,
    )(x, wv, bv2, wo3, bo2)


def reference_forward(x, wv, bv, wo, bo, *, num_heads: int, merge_type: str = 'concat'):
    """Pure-JAX reference mirroring the PyTorch module."""
    B, N, D_in = x.shape
    v = x @ wv + bv
    D_v = v.shape[-1]
    dh = D_v // num_heads
    v = v.reshape(B, N, num_heads, dh).transpose(0, 2, 1, 3)          # b h n d
    attn = jnp.einsum('bhnd,bhmd->bhnm', v, v) / math.sqrt(float(dh))
    attn = jax.nn.softmax(attn, axis=-1)
    o = jnp.einsum('bhnm,bhmd->bhnd', attn, v)                        # b h n d
    if merge_type == 'mean':
        merged = o.mean(axis=1)                                       # (B, N, dh)
    else:
        merged = o.transpose(0, 2, 1, 3).reshape(B, N, D_v)           # b n (h d)
    return merged @ wo + bo


if __name__ == "__main__":
    # Config consistent with the module:
    #   d_model = 32, num_heads = 4, bottleneck_ratio = 1, seq = 8, batch = 2
    B, N, D_MODEL = 2, 8, 32
    NUM_HEADS = 4
    BOTTLENECK_RATIO = 1

    D_IN = D_MODEL
    D_V = D_MODEL // BOTTLENECK_RATIO
    DH = D_V // NUM_HEADS

    key = jax.random.PRNGKey(0)
    kx, kwv, kbv, kwoc, kboc, kwom, kbom = jax.random.split(key, 7)

    x = jax.random.normal(kx, (B, N, D_IN), jnp.float32)

    # PyTorch-Linear-style uniform init, stored in (in, out) layout.
    bound_v = 1.0 / math.sqrt(D_IN)
    wv = jax.random.uniform(kwv, (D_IN, D_V), jnp.float32, -bound_v, bound_v)
    bv = jax.random.uniform(kbv, (D_V,), jnp.float32, -bound_v, bound_v)

    bound_oc = 1.0 / math.sqrt(D_V)
    wo_c = jax.random.uniform(kwoc, (D_V, D_IN), jnp.float32, -bound_oc, bound_oc)
    bo_c = jax.random.uniform(kboc, (D_IN,), jnp.float32, -bound_oc, bound_oc)

    bound_om = 1.0 / math.sqrt(DH)
    wo_m = jax.random.uniform(kwom, (DH, D_IN), jnp.float32, -bound_om, bound_om)
    bo_m = jax.random.uniform(kbom, (D_IN,), jnp.float32, -bound_om, bound_om)

    # --- concat merge, f32 datapath ----------------------------------------
    out_c = jax.block_until_ready(
        shared_qkv_mhsa(x, wv, bv, wo_c, bo_c,
                        num_heads=NUM_HEADS, merge_type='concat'))
    ref_c = reference_forward(x, wv, bv, wo_c, bo_c,
                              num_heads=NUM_HEADS, merge_type='concat')
    assert out_c.shape == (B, N, D_IN), out_c.shape
    assert jnp.allclose(out_c, ref_c, atol=1e-2, rtol=1e-2), \
        float(jnp.max(jnp.abs(out_c - ref_c)))

    # --- mean merge ---------------------------------------------------------
    out_m = jax.block_until_ready(
        shared_qkv_mhsa(x, wv, bv, wo_m, bo_m,
                        num_heads=NUM_HEADS, merge_type='mean'))
    ref_m = reference_forward(x, wv, bv, wo_m, bo_m,
                              num_heads=NUM_HEADS, merge_type='mean')
    assert out_m.shape == (B, N, D_IN), out_m.shape
    assert jnp.allclose(out_m, ref_m, atol=1e-2, rtol=1e-2), \
        float(jnp.max(jnp.abs(out_m - ref_m)))

    # --- bf16 datapath (bf16 MXU operands, f32 softmax/accumulation) --------
    bf = jnp.bfloat16
    out_bf = jax.block_until_ready(
        shared_qkv_mhsa(x.astype(bf), wv.astype(bf), bv.astype(bf),
                        wo_c.astype(bf), bo_c.astype(bf),
                        num_heads=NUM_HEADS, merge_type='concat'))
    assert out_bf.dtype == bf
    assert jnp.allclose(out_bf.astype(jnp.float32), ref_c, atol=8e-2, rtol=8e-2), \
        float(jnp.max(jnp.abs(out_bf.astype(jnp.float32) - ref_c)))

    print("KERNEL_OK")
</pallas_src>

<mosaic_0001>
module attributes {stable_mosaic.version = 11 : i64} {
  func.func @_attn_kernel(%arg0: i32, %arg1: i32, %arg2: memref<1x8x32xf32, #tpu.memory_space<vmem>>, %arg3: memref<32x32xf32, #tpu.memory_space<vmem>>, %arg4: memref<1x32xf32, #tpu.memory_space<vmem>>, %arg5: memref<4x8x32xf32, #tpu.memory_space<vmem>>, %arg6: memref<1x32xf32, #tpu.memory_space<vmem>>, %arg7: memref<1x8x32xf32, #tpu.memory_space<vmem>>, %arg8: memref<4x8x8xf32, #tpu.memory_space<vmem>>) attributes {dimension_semantics = [#tpu.dimension_semantics<parallel>, #tpu.dimension_semantics<arbitrary>], iteration_bounds = array<i64: 2, 1>, scalar_prefetch = 0 : i64, scratch_operands = 1 : i64, tpu.core_type = #tpu.core_type<tc>, window_params = [{transform_indices = @transform_0, window_bounds = array<i64: 1, 8, 32>}, {pipeline_mode = #tpu.pipeline_mode<synchronous>, transform_indices = @transform_1, window_bounds = array<i64: 32, 32>}, {pipeline_mode = #tpu.pipeline_mode<synchronous>, transform_indices = @transform_2, window_bounds = array<i64: 1, 32>}, {pipeline_mode = #tpu.pipeline_mode<synchronous>, transform_indices = @transform_3, window_bounds = array<i64: 4, 8, 32>}, {pipeline_mode = #tpu.pipeline_mode<synchronous>, transform_indices = @transform_4, window_bounds = array<i64: 1, 32>}, {transform_indices = @transform_5, window_bounds = array<i64: 1, 8, 32>}]} {
    %c0_i32 = arith.constant 0 : i32
    %0 = arith.cmpi eq, %arg1, %c0_i32 : i32
    %1 = arith.extui %0 : i1 to i32
    %c0_i32_0 = arith.constant 0 : i32
    %2 = arith.cmpi ne, %1, %c0_i32_0 : i32
    scf.if %2 {
      %c0_58 = arith.constant 0 : index
      %c0_59 = arith.constant 0 : index
      %c0_60 = arith.constant 0 : index
      %106 = vector.load %arg2[%c0_58, %c0_59, %c0_60] : memref<1x8x32xf32, #tpu.memory_space<vmem>>, vector<1x8x32xf32>
      %107 = vector.shape_cast %106 : vector<1x8x32xf32> to vector<8x32xf32>
      %c0_61 = arith.constant 0 : index
      %c0_62 = arith.constant 0 : index
      %108 = vector.load %arg3[%c0_61, %c0_62] : memref<32x32xf32, #tpu.memory_space<vmem>>, vector<32x32xf32>
      %cst_63 = arith.constant dense<0.000000e+00> : vector<8x32xf32>
      %109 = tpu.matmul %107, %108, %cst_63 {dimension_numbers = #tpu.dot_dimension_numbers<[1], [0], [0], [1], [0, 0, 1, 1], [], []>} : vector<8x32xf32>, vector<32x32xf32>, vector<8x32xf32> -> vector<8x32xf32>
      %c0_64 = arith.constant 0 : index
      %c0_65 = arith.constant 0 : index
      %110 = vector.load %arg4[%c0_64, %c0_65] : memref<1x32xf32, #tpu.memory_space<vmem>>, vector<1x32xf32>
      %111 = vector.shape_cast %110 : vector<1x32xf32> to vector<32xf32>
      %112 = vector.shape_cast %111 : vector<32xf32> to vector<1x32xf32>
      %113 = vector.broadcast %112 : vector<1x32xf32> to vector<8x32xf32>
      %114 = arith.addf %109, %113 : vector<8x32xf32>
      %115 = vector.extract_strided_slice %114 {offsets = [0, 0], sizes = [8, 8], strides = [1, 1]} : vector<8x32xf32> to vector<8x8xf32>
      %c0_66 = arith.constant 0 : index
      %c0_67 = arith.constant 0 : index
      %c0_68 = arith.constant 0 : index
      %116 = vector.load %arg8[%c0_66, %c0_67, %c0_68] : memref<4x8x8xf32, #tpu.memory_space<vmem>>, vector<1x8x8xf32>
      %117 = vector.shape_cast %116 : vector<1x8x8xf32> to vector<8x8xf32>
      %118 = vector.shape_cast %115 : vector<8x8xf32> to vector<1x8x8xf32>
      tpu.vector_store %arg8[%c0_66, %c0_67, %c0_68], %118 {strides = array<i32>} : memref<4x8x8xf32, #tpu.memory_space<vmem>>, vector<1x8x8xf32>,
      %119 = vector.extract_strided_slice %114 {offsets = [0, 8], sizes = [8, 8], strides = [1, 1]} : vector<8x32xf32> to vector<8x8xf32>
      %c1_69 = arith.constant 1 : index
      %c0_70 = arith.constant 0 : index
      %c0_71 = arith.constant 0 : index
      %120 = vector.load %arg8[%c1_69, %c0_70, %c0_71] : memref<4x8x8xf32, #tpu.memory_space<vmem>>, vector<1x8x8xf32>
      %121 = vector.shape_cast %120 : vector<1x8x8xf32> to vector<8x8xf32>
      %122 = vector.shape_cast %119 : vector<8x8xf32> to vector<1x8x8xf32>
      tpu.vector_store %arg8[%c1_69, %c0_70, %c0_71], %122 {strides = array<i32>} : memref<4x8x8xf32, #tpu.memory_space<vmem>>, vector<1x8x8xf32>,
      %123 = vector.extract_strided_slice %114 {offsets = [0, 16], sizes = [8, 8], strides = [1, 1]} : vector<8x32xf32> to vector<8x8xf32>
      %c2_72 = arith.constant 2 : index
      %c0_73 = arith.constant 0 : index
      %c0_74 = arith.constant 0 : index
      %124 = vector.load %arg8[%c2_72, %c0_73, %c0_74] : memref<4x8x8xf32, #tpu.memory_space<vmem>>, vector<1x8x8xf32>
      %125 = vector.shape_cast %124 : vector<1x8x8xf32> to vector<8x8xf32>
      %126 = vector.shape_cast %123 : vector<8x8xf32> to vector<1x8x8xf32>
      tpu.vector_store %arg8[%c2_72, %c0_73, %c0_74], %126 {strides = array<i32>} : memref<4x8x8xf32, #tpu.memory_space<vmem>>, vector<1x8x8xf32>,
      %127 = vector.extract_strided_slice %114 {offsets = [0, 24], sizes = [8, 8], strides = [1, 1]} : vector<8x32xf32> to vector<8x8xf32>
      %c3_75 = arith.constant 3 : index
      %c0_76 = arith.constant 0 : index
      %c0_77 = arith.constant 0 : index
      %128 = vector.load %arg8[%c3_75, %c0_76, %c0_77] : memref<4x8x8xf32, #tpu.memory_space<vmem>>, vector<1x8x8xf32>
      %129 = vector.shape_cast %128 : vector<1x8x8xf32> to vector<8x8xf32>
      %130 = vector.shape_cast %127 : vector<8x8xf32> to vector<1x8x8xf32>
      tpu.vector_store %arg8[%c3_75, %c0_76, %c0_77], %130 {strides = array<i32>} : memref<4x8x8xf32, #tpu.memory_space<vmem>>, vector<1x8x8xf32>,
    } else {
    }
    %c8_i32 = arith.constant 8 : i32
    %3 = arith.muli %arg1, %c8_i32 : i32
    %4 = tpu.assume_multiple %3, 8 : i32
    %cst = arith.constant 0.000000e+00 : f32
    %5 = vector.broadcast %cst : f32 to vector<8x32xf32>
    %c0 = arith.constant 0 : index
    %c0_1 = arith.constant 0 : index
    %c0_2 = arith.constant 0 : index
    %6 = vector.load %arg8[%c0, %c0_1, %c0_2] : memref<4x8x8xf32, #tpu.memory_space<vmem>>, vector<1x8x8xf32>
    %7 = vector.shape_cast %6 : vector<1x8x8xf32> to vector<8x8xf32>
    %c0_3 = arith.constant 0 : index
    %8 = arith.index_cast %4 : i32 to index
    %c0_4 = arith.constant 0 : index
    %9 = vector.load %arg8[%c0_3, %8, %c0_4] : memref<4x8x8xf32, #tpu.memory_space<vmem>>, vector<1x8x8xf32>
    %10 = vector.shape_cast %9 : vector<1x8x8xf32> to vector<8x8xf32>
    %cst_5 = arith.constant dense<0.000000e+00> : vector<8x8xf32>
    %11 = tpu.matmul %10, %7, %cst_5 {dimension_numbers = #tpu.dot_dimension_numbers<[1], [1], [0], [0], [0, 0, 1, 0], [], []>} : vector<8x8xf32>, vector<8x8xf32>, vector<8x8xf32> -> vector<8x8xf32>
    %cst_6 = arith.constant 0.353553385 : f32
    %12 = vector.broadcast %cst_6 : f32 to vector<8x8xf32>
    %13 = arith.mulf %11, %12 : vector<8x8xf32>
    %cst_7 = arith.constant dense<0xFF800000> : vector<8xf32>
    %14 = vector.multi_reduction <maximumf>, %13, %cst_7 [1] : vector<8x8xf32> to vector<8xf32>
    %15 = vector.shape_cast %14 : vector<8xf32> to vector<8x1xf32>
    %16 = vector.broadcast %15 : vector<8x1xf32> to vector<8x8xf32>
    %17 = arith.subf %13, %16 : vector<8x8xf32>
    %18 = math.exp %17 : vector<8x8xf32>
    %cst_8 = arith.constant dense<0.000000e+00> : vector<8xf32>
    %19 = vector.multi_reduction <add>, %18, %cst_8 [1] : vector<8x8xf32> to vector<8xf32>
    %20 = vector.shape_cast %19 : vector<8xf32> to vector<8x1xf32>
    %cst_9 = arith.constant dense<0.000000e+00> : vector<8x8xf32>
    %21 = tpu.matmul %18, %7, %cst_9 {dimension_numbers = #tpu.dot_dimension_numbers<[1], [0], [0], [1], [0, 0, 1, 1], [], []>} : vector<8x8xf32>, vector<8x8xf32>, vector<8x8xf32> -> vector<8x8xf32>
    %22 = tpu.reciprocal %20 {approx = true} : vector<8x1xf32> -> vector<8x1xf32>
    %23 = vector.broadcast %22 : vector<8x1xf32> to vector<8x8xf32>
    %24 = arith.mulf %21, %23 : vector<8x8xf32>
    %c0_10 = arith.constant 0 : index
    %c0_11 = arith.constant 0 : index
    %c0_12 = arith.constant 0 : index
    %25 = vector.load %arg5[%c0_10, %c0_11, %c0_12] : memref<4x8x32xf32, #tpu.memory_space<vmem>>, vector<1x8x32xf32>
    %26 = vector.shape_cast %25 : vector<1x8x32xf32> to vector<8x32xf32>
    %cst_13 = arith.constant dense<0.000000e+00> : vector<8x32xf32>
    %27 = tpu.matmul %24, %26, %cst_13 {dimension_numbers = #tpu.dot_dimension_numbers<[1], [0], [0], [1], [0, 0, 1, 1], [], []>} : vector<8x8xf32>, vector<8x32xf32>, vector<8x32xf32> -> vector<8x32xf32>
    %28 = arith.addf %5, %27 : vector<8x32xf32>
    %c1 = arith.constant 1 : index
    %c0_14 = arith.constant 0 : index
    %c0_15 = arith.constant 0 : index
    %29 = vector.load %arg8[%c1, %c0_14, %c0_15] : memref<4x8x8xf32, #tpu.memory_space<vmem>>, vector<1x8x8xf32>
    %30 = vector.shape_cast %29 : vector<1x8x8xf32> to vector<8x8xf32>
    %c1_16 = arith.constant 1 : index
    %31 = arith.index_cast %4 : i32 to index
    %c0_17 = arith.constant 0 : index
    %32 = vector.load %arg8[%c1_16, %31, %c0_17] : memref<4x8x8xf32, #tpu.memory_space<vmem>>, vector<1x8x8xf32>
    %33 = vector.shape_cast %32 : vector<1x8x8xf32> to vector<8x8xf32>
    %cst_18 = arith.constant dense<0.000000e+00> : vector<8x8xf32>
    %34 = tpu.matmul %33, %30, %cst_18 {dimension_numbers = #tpu.dot_dimension_numbers<[1], [1], [0], [0], [0, 0, 1, 0], [], []>} : vector<8x8xf32>, vector<8x8xf32>, vector<8x8xf32> -> vector<8x8xf32>
    %cst_19 = arith.constant 0.353553385 : f32
    %35 = vector.broadcast %cst_19 : f32 to vector<8x8xf32>
    %36 = arith.mulf %34, %35 : vector<8x8xf32>
    %cst_20 = arith.constant dense<0xFF800000> : vector<8xf32>
    %37 = vector.multi_reduction <maximumf>, %36, %cst_20 [1] : vector<8x8xf32> to vector<8xf32>
    %38 = vector.shape_cast %37 : vector<8xf32> to vector<8x1xf32>
    %39 = vector.broadcast %38 : vector<8x1xf32> to vector<8x8xf32>
    %40 = arith.subf %36, %39 : vector<8x8xf32>
    %41 = math.exp %40 : vector<8x8xf32>
    %cst_21 = arith.constant dense<0.000000e+00> : vector<8xf32>
    %42 = vector.multi_reduction <add>, %41, %cst_21 [1] : vector<8x8xf32> to vector<8xf32>
    %43 = vector.shape_cast %42 : vector<8xf32> to vector<8x1xf32>
    %cst_22 = arith.constant dense<0.000000e+00> : vector<8x8xf32>
    %44 = tpu.matmul %41, %30, %cst_22 {dimension_numbers = #tpu.dot_dimension_numbers<[1], [0], [0], [1], [0, 0, 1, 1], [], []>} : vector<8x8xf32>, vector<8x8xf32>, vector<8x8xf32> -> vector<8x8xf32>
    %45 = tpu.reciprocal %43 {approx = true} : vector<8x1xf32> -> vector<8x1xf32>
    %46 = vector.broadcast %45 : vector<8x1xf32> to vector<8x8xf32>
    %47 = arith.mulf %44, %46 : vector<8x8xf32>
    %c1_23 = arith.constant 1 : index
    %c0_24 = arith.constant 0 : index
    %c0_25 = arith.constant 0 : index
    %48 = vector.load %arg5[%c1_23, %c0_24, %c0_25] : memref<4x8x32xf32, #tpu.memory_space<vmem>>, vector<1x8x32xf32>
    %49 = vector.shape_cast %48 : vector<1x8x32xf32> to vector<8x32xf32>
    %cst_26 = arith.constant dense<0.000000e+00> : vector<8x32xf32>
    %50 = tpu.matmul %47, %49, %cst_26 {dimension_numbers = #tpu.dot_dimension_numbers<[1], [0], [0], [1], [0, 0, 1, 1], [], []>} : vector<8x8xf32>, vector<8x32xf32>, vector<8x32xf32> -> vector<8x32xf32>
    %51 = arith.addf %28, %50 : vector<8x32xf32>
    %c2 = arith.constant 2 : index
    %c0_27 = arith.constant 0 : index
    %c0_28 = arith.constant 0 : index
    %52 = vector.load %arg8[%c2, %c0_27, %c0_28] : memref<4x8x8xf32, #tpu.memory_space<vmem>>, vector<1x8x8xf32>
    %53 = vector.shape_cast %52 : vector<1x8x8xf32> to vector<8x8xf32>
    %c2_29 = arith.constant 2 : index
    %54 = arith.index_cast %4 : i32 to index
    %c0_30 = arith.constant 0 : index
    %55 = vector.load %arg8[%c2_29, %54, %c0_30] : memref<4x8x8xf32, #tpu.memory_space<vmem>>, vector<1x8x8xf32>
    %56 = vector.shape_cast %55 : vector<1x8x8xf32> to vector<8x8xf32>
    %cst_31 = arith.constant dense<0.000000e+00> : vector<8x8xf32>
    %57 = tpu.matmul %56, %53, %cst_31 {dimension_numbers = #tpu.dot_dimension_numbers<[1], [1], [0], [0], [0, 0, 1, 0], [], []>} : vector<8x8xf32>, vector<8x8xf32>, vector<8x8xf32> -> vector<8x8xf32>
    %cst_32 = arith.constant 0.353553385 : f32
    %58 = vector.broadcast %cst_32 : f32 to vector<8x8xf32>
    %59 = arith.mulf %57, %58 : vector<8x8xf32>
    %cst_33 = arith.constant dense<0xFF800000> : vector<8xf32>
    %60 = vector.multi_reduction <maximumf>, %59, %cst_33 [1] : vector<8x8xf32> to vector<8xf32>
    %61 = vector.shape_cast %60 : vector<8xf32> to vector<8x1xf32>
    %62 = vector.broadcast %61 : vector<8x1xf32> to vector<8x8xf32>
    %63 = arith.subf %59, %62 : vector<8x8xf32>
    %64 = math.exp %63 : vector<8x8xf32>
    %cst_34 = arith.constant dense<0.000000e+00> : vector<8xf32>
    %65 = vector.multi_reduction <add>, %64, %cst_34 [1] : vector<8x8xf32> to vector<8xf32>
    %66 = vector.shape_cast %65 : vector<8xf32> to vector<8x1xf32>
    %cst_35 = arith.constant dense<0.000000e+00> : vector<8x8xf32>
    %67 = tpu.matmul %64, %53, %cst_35 {dimension_numbers = #tpu.dot_dimension_numbers<[1], [0], [0], [1], [0, 0, 1, 1], [], []>} : vector<8x8xf32>, vector<8x8xf32>, vector<8x8xf32> -> vector<8x8xf32>
    %68 = tpu.reciprocal %66 {approx = true} : vector<8x1xf32> -> vector<8x1xf32>
    %69 = vector.broadcast %68 : vector<8x1xf32> to vector<8x8xf32>
    %70 = arith.mulf %67, %69 : vector<8x8xf32>
    %c2_36 = arith.constant 2 : index
    %c0_37 = arith.constant 0 : index
    %c0_38 = arith.constant 0 : index
    %71 = vector.load %arg5[%c2_36, %c0_37, %c0_38] : memref<4x8x32xf32, #tpu.memory_space<vmem>>, vector<1x8x32xf32>
    %72 = vector.shape_cast %71 : vector<1x8x32xf32> to vector<8x32xf32>
    %cst_39 = arith.constant dense<0.000000e+00> : vector<8x32xf32>
    %73 = tpu.matmul %70, %72, %cst_39 {dimension_numbers = #tpu.dot_dimension_numbers<[1], [0], [0], [1], [0, 0, 1, 1], [], []>} : vector<8x8xf32>, vector<8x32xf32>, vector<8x32xf32> -> vector<8x32xf32>
    %74 = arith.addf %51, %73 : vector<8x32xf32>
    %c3 = arith.constant 3 : index
    %c0_40 = arith.constant 0 : index
    %c0_41 = arith.constant 0 : index
    %75 = vector.load %arg8[%c3, %c0_40, %c0_41] : memref<4x8x8xf32, #tpu.memory_space<vmem>>, vector<1x8x8xf32>
    %76 = vector.shape_cast %75 : vector<1x8x8xf32> to vector<8x8xf32>
    %c3_42 = arith.constant 3 : index
    %77 = arith.index_cast %4 : i32 to index
    %c0_43 = arith.constant 0 : index
    %78 = vector.load %arg8[%c3_42, %77, %c0_43] : memref<4x8x8xf32, #tpu.memory_space<vmem>>, vector<1x8x8xf32>
    %79 = vector.shape_cast %78 : vector<1x8x8xf32> to vector<8x8xf32>
    %cst_44 = arith.constant dense<0.000000e+00> : vector<8x8xf32>
    %80 = tpu.matmul %79, %76, %cst_44 {dimension_numbers = #tpu.dot_dimension_numbers<[1], [1], [0], [0], [0, 0, 1, 0], [], []>} : vector<8x8xf32>, vector<8x8xf32>, vector<8x8xf32> -> vector<8x8xf32>
    %cst_45 = arith.constant 0.353553385 : f32
    %81 = vector.broadcast %cst_45 : f32 to vector<8x8xf32>
    %82 = arith.mulf %80, %81 : vector<8x8xf32>
    %cst_46 = arith.constant dense<0xFF800000> : vector<8xf32>
    %83 = vector.multi_reduction <maximumf>, %82, %cst_46 [1] : vector<8x8xf32> to vector<8xf32>
    %84 = vector.shape_cast %83 : vector<8xf32> to vector<8x1xf32>
    %85 = vector.broadcast %84 : vector<8x1xf32> to vector<8x8xf32>
    %86 = arith.subf %82, %85 : vector<8x8xf32>
    %87 = math.exp %86 : vector<8x8xf32>
    %cst_47 = arith.constant dense<0.000000e+00> : vector<8xf32>
    %88 = vector.multi_reduction <add>, %87, %cst_47 [1] : vector<8x8xf32> to vector<8xf32>
    %89 = vector.shape_cast %88 : vector<8xf32> to vector<8x1xf32>
    %cst_48 = arith.constant dense<0.000000e+00> : vector<8x8xf32>
    %90 = tpu.matmul %87, %76, %cst_48 {dimension_numbers = #tpu.dot_dimension_numbers<[1], [0], [0], [1], [0, 0, 1, 1], [], []>} : vector<8x8xf32>, vector<8x8xf32>, vector<8x8xf32> -> vector<8x8xf32>
    %91 = tpu.reciprocal %89 {approx = true} : vector<8x1xf32> -> vector<8x1xf32>
    %92 = vector.broadcast %91 : vector<8x1xf32> to vector<8x8xf32>
    %93 = arith.mulf %90, %92 : vector<8x8xf32>
    %c3_49 = arith.constant 3 : index
    %c0_50 = arith.constant 0 : index
    %c0_51 = arith.constant 0 : index
    %94 = vector.load %arg5[%c3_49, %c0_50, %c0_51] : memref<4x8x32xf32, #tpu.memory_space<vmem>>, vector<1x8x32xf32>
    %95 = vector.shape_cast %94 : vector<1x8x32xf32> to vector<8x32xf32>
    %cst_52 = arith.constant dense<0.000000e+00> : vector<8x32xf32>
    %96 = tpu.matmul %93, %95, %cst_52 {dimension_numbers = #tpu.dot_dimension_numbers<[1], [0], [0], [1], [0, 0, 1, 1], [], []>} : vector<8x8xf32>, vector<8x32xf32>, vector<8x32xf32> -> vector<8x32xf32>
    %97 = arith.addf %74, %96 : vector<8x32xf32>
    %c0_53 = arith.constant 0 : index
    %c0_54 = arith.constant 0 : index
    %98 = vector.load %arg6[%c0_53, %c0_54] : memref<1x32xf32, #tpu.memory_space<vmem>>, vector<1x32xf32>
    %99 = vector.shape_cast %98 : vector<1x32xf32> to vector<32xf32>
    %100 = vector.shape_cast %99 : vector<32xf32> to vector<1x32xf32>
    %101 = vector.broadcast %100 : vector<1x32xf32> to vector<8x32xf32>
    %102 = arith.addf %97, %101 : vector<8x32xf32>
    %c0_55 = arith.constant 0 : index
    %c0_56 = arith.constant 0 : index
    %c0_57 = arith.constant 0 : index
    %103 = vector.load %arg7[%c0_55, %c0_56, %c0_57] : memref<1x8x32xf32, #tpu.memory_space<vmem>>, vector<1x8x32xf32>
    %104 = vector.shape_cast %103 : vector<1x8x32xf32> to vector<8x32xf32>
    %105 = vector.shape_cast %102 : vector<8x32xf32> to vector<1x8x32xf32>
    tpu.vector_store %arg7[%c0_55, %c0_56, %c0_57], %105 {strides = array<i32>} : memref<1x8x32xf32, #tpu.memory_space<vmem>>, vector<1x8x32xf32>,
    return
  }
  func.func @transform_0(%arg0: i32, %arg1: i32) -> (i32, i32, i32) {
    %c0_i32 = arith.constant 0 : i32
    %c0_i32_0 = arith.constant 0 : i32
    %c0_i32_1 = arith.constant 0 : i32
    return %arg0, %c0_i32, %c0_i32_0 : i32, i32, i32
  }
  func.func @transform_1(%arg0: i32, %arg1: i32) -> (i32, i32) {
    %c0_i32 = arith.constant 0 : i32
    %c0_i32_0 = arith.constant 0 : i32
    %c0_i32_1 = arith.constant 0 : i32
    return %c0_i32, %c0_i32_0 : i32, i32
  }
  func.func @transform_2(%arg0: i32, %arg1: i32) -> (i32, i32) {
    %c0_i32 = arith.constant 0 : i32
    %c0_i32_0 = arith.constant 0 : i32
    %c0_i32_1 = arith.constant 0 : i32
    return %c0_i32, %c0_i32_0 : i32, i32
  }
  func.func @transform_3(%arg0: i32, %arg1: i32) -> (i32, i32, i32) {
    %c0_i32 = arith.constant 0 : i32
    %c0_i32_0 = arith.constant 0 : i32
    %c0_i32_1 = arith.constant 0 : i32
    %c0_i32_2 = arith.constant 0 : i32
    return %c0_i32, %c0_i32_0, %c0_i32_1 : i32, i32, i32
  }
  func.func @transform_4(%arg0: i32, %arg1: i32) -> (i32, i32) {
    %c0_i32 = arith.constant 0 : i32
    %c0_i32_0 = arith.constant 0 : i32
    %c0_i32_1 = arith.constant 0 : i32
    return %c0_i32, %c0_i32_0 : i32, i32
  }
  func.func @transform_5(%arg0: i32, %arg1: i32) -> (i32, i32, i32) {
    %c0_i32 = arith.constant 0 : i32
    %c0_i32_0 = arith.constant 0 : i32
    return %arg0, %arg1, %c0_i32 : i32, i32, i32
  }
}

</mosaic_0001>

<bundles_post_ra>
// kernel: tpu_custom_call.1
= control target key start
LH: loop header
LB: loop body
LE: loop exit
PB: predicated region body
PF: predicated region fallthrough
CT: control target
= control target key end

     0   :  { %10 = vsyncpa [#allocation4], 0  ;;  %s2461_s0 = inlined_call_operand.hbm [shape: f32[2,8,32], index: 0, kind: input, shape index: {}]   ;;  %s2462_s1 = inlined_call_operand.hbm [shape: f32[32,32], index: 1, kind: input, shape index: {}]   ;;  %s2463_s2 = inlined_call_operand.hbm [shape: f32[1,32], index: 2, kind: input, shape index: {}]   ;;  %s2464_s3 = inlined_call_operand.hbm [shape: f32[4,8,32], index: 3, kind: input, shape index: {}]   ;;  %s2465_s4 = inlined_call_operand.hbm [shape: f32[1,32], index: 4, kind: input, shape index: {}]   ;;  %s2466_s5 = inlined_call_operand.hbm [shape: f32[2,8,32], index: 5, kind: output, shape index: {}]  }
   0x1   :  { %12 = vsyncpa [#allocation4 + $0x1], 0 }
   0x2   :  { %13 = vsyncpa [#allocation7], 0 }
   0x3   :  { %14 = vsyncpa [#allocation10], 0 }
   0x4   :  { %15 = vsyncpa [#allocation5], 0 }
   0x5   :  { %17 = vsyncpa [#allocation5 + $0x1], 0  ;;  %s2088_s18 = smov 0   ;;  %s2090_s19 = smov 0  }
   0x6   :  { %s2092_s20 = smov 0   ;;  %s2094_s21 = smov 0  }
   0x7   :  { %s2096_s22 = smov 0   ;;  %s2098_s23 = smov 0  }
   0x8 LB: > { %s1534_s24 = sadd.s32 4294967295, %s2042_s23   ;;  %p1536_p0 = scmp.ge.s32.totalorder %s2042_s23, 1  ;;  %s2042_s23 = sphi %s2098_s23, %s23_s23   ;;  %s2038_s22 = sphi %s2096_s22, %s2490_s22   ;;  %s2034_s21 = sphi %s2094_s21, %s2489_s21   ;;  %s2030_s20 = sphi %s2092_s20, %s2488_s20   ;;  %s2026_s19 = sphi %s2090_s19, %s2487_s19   ;;  %s2022_s18 = sphi %s2088_s18, %s2486_s18  }
   0x9   : > { %p2122_p1 = scmp.eq.s32.totalorder %s1534_s24, 0  ;;  %p178_p2 = scmp.lt.s32.totalorder %s2042_s23, 3 }
   0xa   : > { %s2044_s27 = smov [#allocation6]   ;;  %s2045_s30 = smov [#allocation9]  }
   0xb   : > { %s2471_s25 = scalar_select %p2122_p1, 1, 0 }
   0xc   : > { %p2127_p3 = pnand %p1536_p0, %p178_p2  ;;  %s190_s28 = sshll.u32 %s2044_s27, 4  ;;  %s2131_s28 = int_to_ptr.vmem [resolvable:$true] %s190_s28 }
   0xd   : > { %s214_s6 = sshll.u32 %s2045_s30, 4  ;;  %s2046_s7 = smov [#allocation8]   ;;  %s2142_s6 = int_to_ptr.vmem [resolvable:$true] %s214_s6 }
   0xe   : > { %s2472_s26 = scalar_select %p2127_p3, 1, 0 }
   0xf   : > { %p1703_p4 = pneg %p2127_p3  ;;  %s2144_s8 = sshll.u32 %s2046_s7, 4  ;;  %s205_s8 = int_to_ptr.vmem [resolvable:$true] %s2144_s8 }
  0x10   : > { %s1810_s11 = scalar_lea.hbm %s2462_s1, 512 }
  0x11   : > { %p2138_p6 = pnand %p1703_p4, %p2122_p1  ;;  %p1811_p7 = scmp.ne.s32.totalorder %s2462_s1, %s1810_s11 }
  0x12   : > { %p1817_p11 = scmp.lt.u32.totalorder %s1810_s11, %s2462_s1 }
  0x13   : > { %p2154_p8 = pneg %p2138_p6 }
  0x15   : > { %p1813_p9 = pnand %p2154_p8, %p1811_p7 }
  0x17   : > { %p1814_p10 = pneg %p1813_p9 }
  0x19   : > { %p1819_p12 = pnand %p1817_p11, %p1814_p10 }
  0x1b   : > { %1822 = shalt.err (!%p1819_p12)
}
  0x1c   : > { %s1823_s17 = scalar_lea.vmem %s2131_s28, 512  ;;  %p1831_p4 = scmp.lt.s32.totalorder %s2131_s28, %s2131_s28 }
  0x1d   : > { %p1824_p13 = scmp.ne.s32.totalorder %s2131_s28, %s1823_s17  ;;  %p1832_p5 = scmp.lt.s32.totalorder %s1823_s17, %s1823_s17 }
  0x1f   : > { %p1826_p0 = pnand %p1824_p13, %p2154_p8  ;;  %p1833_p7 = por %p1832_p5, %p1831_p4 }
  0x21   : > { %p1827_p2 = pneg %p1826_p0 }
  0x23   : > { %p1834_p9 = pnand %p1833_p7, %p1827_p2 }
  0x25   : > { %1837 = shalt.err (!%p1834_p9)
}
  0x26   : > { %s2047_s27 = smov 128   ;;  %s2048_s30 = smov 8  }
  0x27   : > { %1706 = dma.hbm_to_vmem [thread:$0]  (!%p2138_p6), %s2462_s1, 512, %s2131_s28, [#allocation7], %s2047_s27, %s2047_s27, %s2048_s30  }
  0x28   : > { %s1838_s12 = scalar_lea.hbm %s2464_s3, 512 }
  0x29   : > { %p1839_p5 = scmp.ne.s32.totalorder %s2464_s3, %s1838_s12  ;;  %p1845_p12 = scmp.lt.u32.totalorder %s1838_s12, %s2464_s3 }
  0x2b   : > { %p1841_p10 = pnand %p1839_p5, %p2154_p8 }
  0x2d   : > { %p1842_p11 = pneg %p1841_p10 }
  0x2f   : > { %p1847_p13 = pnand %p1845_p12, %p1842_p11 }
  0x31   : > { %1850 = shalt.err (!%p1847_p13)
}
  0x32   : > { %s1851_s28 = scalar_lea.vmem %s2142_s6, 512  ;;  %p1859_p7 = scmp.lt.s32.totalorder %s2142_s6, %s2142_s6 }
  0x33   : > { %p1852_p0 = scmp.ne.s32.totalorder %s2142_s6, %s1851_s28  ;;  %p1860_p9 = scmp.lt.s32.totalorder %s1851_s28, %s1851_s28 }
  0x35   : > { %p1854_p2 = pnand %p1852_p0, %p2154_p8  ;;  %p1861_p5 = por %p1860_p9, %p1859_p7 }
  0x37   : > { %p1855_p4 = pneg %p1854_p2 }
  0x39   : > { %p1862_p10 = pnand %p1861_p5, %p1855_p4 }
  0x3b   : > { %1865 = shalt.err (!%p1862_p10)
}
  0x3c   : > { %1712 = dma.hbm_to_vmem [thread:$0]  (!%p2138_p6), %s2464_s3, 512, %s2142_s6, [#allocation10], %s2047_s27, %s2047_s27, %s2048_s30  }
  0x3d   : > { %s1866_s12 = scalar_lea.hbm %s2463_s2, 16 }
  0x3e   : > { %p1867_p11 = scmp.ne.s32.totalorder %s2463_s2, %s1866_s12  ;;  %p1873_p0 = scmp.lt.u32.totalorder %s1866_s12, %s2463_s2 }
  0x40   : > { %p1869_p12 = pnand %p1867_p11, %p2154_p8 }
  0x42   : > { %p1870_p13 = pneg %p1869_p12 }
  0x44   : > { %p1875_p2 = pnand %p1873_p0, %p1870_p13 }
  0x46   : > { %1878 = shalt.err (!%p1875_p2)
}
  0x47   : > { %s1879_s28 = scalar_lea.vmem %s205_s8, 16  ;;  %s1886_s6 = scalar_lea.vmem %s205_s8, 32 }
  0x48   : > { %p1880_p4 = scmp.ne.s32.totalorder %s205_s8, %s1879_s28  ;;  %p1887_p5 = scmp.lt.s32.totalorder %s205_s8, %s205_s8 }
  0x49   : > { %p1888_p10 = scmp.lt.s32.totalorder %s1886_s6, %s1879_s28 }
  0x4a   : > { %p1882_p7 = pnand %p1880_p4, %p2154_p8 }
  0x4b   : > { %p1889_p3 = por %p1888_p10, %p1887_p5 }
  0x4c   : > { %p1883_p9 = pneg %p1882_p7 }
  0x4e   : > { %p1890_p1 = pnand %p1889_p3, %p1883_p9 }
  0x50   : > { %1893 = shalt.err (!%p1890_p1)
}
  0x51   : > { %1709 = dma.hbm_to_vmem [thread:$0]  (!%p2138_p6), %s2463_s2, 16, %s205_s8, [#allocation7]  }
  0x52   : > { %s2049_s7 = smov [#allocation11]   ;;  %s1894_s12 = scalar_lea.hbm %s2465_s4, 16 }
  0x53   : > { %s228_s9 = sshll.u32 %s2049_s7, 4  ;;  %p1895_p11 = scmp.ne.s32.totalorder %s2465_s4, %s1894_s12  ;;  %s229_s9 = int_to_ptr.vmem [resolvable:$true] %s228_s9 }
  0x54   : > { %p1901_p12 = scmp.lt.u32.totalorder %s1894_s12, %s2465_s4 }
  0x55   : > { %p1897_p1 = pnand %p1895_p11, %p2154_p8 }
  0x57   : > { %p1898_p3 = pneg %p1897_p1 }
  0x59   : > { %p1903_p13 = pnand %p1901_p12, %p1898_p3 }
  0x5b   : > { %1906 = shalt.err (!%p1903_p13)
}
  0x5c   : > { %s1907_s8 = scalar_lea.vmem %s229_s9, 16  ;;  %s1914_s28 = scalar_lea.vmem %s229_s9, 32 }
  0x5d   : > { %p1908_p0 = scmp.ne.s32.totalorder %s229_s9, %s1907_s8  ;;  %p1915_p7 = scmp.lt.s32.totalorder %s229_s9, %s229_s9 }
  0x5e   : > { %p1916_p9 = scmp.lt.s32.totalorder %s1914_s28, %s1907_s8 }
  0x5f   : > { %p1910_p2 = pnand %p1908_p0, %p2154_p8 }
  0x60   : > { %p1917_p5 = por %p1916_p9, %p1915_p7 }
  0x61   : > { %p1911_p4 = pneg %p1910_p2 }
  0x63   : > { %p1918_p10 = pnand %p1917_p5, %p1911_p4 }
  0x65   : > { %1921 = shalt.err (!%p1918_p10)
}
  0x66   : > { %1715 = dma.hbm_to_vmem [thread:$0]  (!%p2138_p6), %s2465_s4, 16, %s229_s9, [#allocation10]  }
  0x67   : > { %s1535_s14 = sadd.s32 4294967294, %s2042_s23   ;;  %s35_s30 = sadd.s32 1, %s2038_s22 }
  0x68   : > { %p37_p8 = scmp.ge.s32.totalorder %s35_s30, 2  ;;  %s42_s29 = sadd.s32 1, %s2030_s20 }
  0x69   : > { %p49_p11 = scmp.ne.s32.totalorder %s2030_s20, %s2026_s19  ;;  %p50_p1 = scmp.eq.s32.totalorder %s2042_s23, 0 }
  0x6a   : > { %s2492_s30 = smov (%p37_p8, %s35_s30), 0  ;;  %p55_p12 = scmp.ne.s32.totalorder %s2026_s19, %s2022_s18 }
  0x6b   : > { %p2243_p3 = por %p50_p1, %p49_p11  ;;  %s39_s9 = ssub.s32 %s2038_s22, %s2492_s30 }
  0x6c   : > { %p165_p6 = scmp.eq.s32.totalorder %s1534_s24, 1  ;;  %p40_p13 = scmp.eq.s32.totalorder %s39_s9, 0 }
  0x6d   : > { %p2476_p0 = scmp.ne.s32.totalorder %s2471_s25, 0  ;;  %p171_p7 = scmp.eq.s32.totalorder %s1535_s14, 1 }
  0x6e   : > { %p2259_p4 = por %p165_p6, %p49_p11  ;;  %p1728_p5 = scmp.lt.s32.totalorder %s2042_s23, 2 }
  0x6f   : > { %p2255_p2 = por %p2476_p0, %p55_p12  ;;  %p2266_p9 = por %p171_p7, %p55_p12 }
  0x70   : > { %s2478_s11 = scalar_select %p2259_p4, 1, 0 }
  0x71   : > { %s2264_s12 = scalar_select %p40_p13, %s2030_s20, %s42_s29  }
  0x72   : > { %s2479_s13 = scalar_select %p2266_p9, 1, 0 }
  0x73   : > { %s239_s15 = sand.u32 1, %s2030_s20   ;;  %s1543_s24 = sshll.u32 %s2038_s22, 7 }
  0x74   : > { %s1542_s16 = sshll.u32 %s239_s15, 3  ;;  %s2276_s28 = scalar_lea.hbm %s2461_s0, %s1543_s24 }
  0x75   : > { %s243_s6 = scalar_lea.vmem [#allocation3], %s1542_s16  ;;  %p2280_p10 = pnand %p1728_p5, %p2243_p3 }
  0x76   : > { %s250_s27 = sshll.u32 %s243_s6, 4  ;;  %s240_s29 = scalar_lea.sflag [#allocation4], %s239_s15  ;;  %s2284_s27 = int_to_ptr.vmem [resolvable:$true] %s250_s27 }
  0x77   : > { %s1922_s9 = scalar_lea.hbm %s2276_s28, 128  ;;  %p1924_p11 = pneg %p2280_p10 }
  0x78   : > { %p1923_p8 = scmp.ne.s32.totalorder %s2276_s28, %s1922_s9  ;;  %s1927_s7 = scalar_lea.hbm %s2461_s0, 256 }
  0x79   : > { %p1928_p3 = scmp.lt.u32.totalorder %s2276_s28, %s2461_s0  ;;  %p1929_p6 = scmp.lt.u32.totalorder %s1927_s7, %s1922_s9 }
  0x7a   : > { %p1925_p1 = pnand %p1924_p11, %p1923_p8  ;;  %p1931_p0 = scmp.lt.u32.totalorder %s1922_s9, %s2276_s28 }
  0x7b   : > { %p1930_p13 = por %p1929_p6, %p1928_p3 }
  0x7c   : > { %p1926_p12 = pneg %p1925_p1 }
  0x7d   : > { %p1932_p7 = por %p1931_p0, %p1930_p13 }
  0x7f   : > { %p1933_p5 = pnand %p1932_p7, %p1926_p12 }
  0x81   : > { %1936 = shalt.err (!%p1933_p5)
}
  0x82   : > { %s1937_s15 = scalar_lea.vmem %s2284_s27, 128  ;;  %s2050_s6 = smov [#allocation3]  }
  0x83   : > { %p1938_p8 = scmp.ne.s32.totalorder %s2284_s27, %s1937_s15  ;;  %s1942_s24 = sshll.u32 %s2050_s6, 4  ;;  %s1943_s24 = int_to_ptr.vmem [resolvable:$false] %s1942_s24 }
  0x84   : > { %s1944_s16 = scalar_lea.vmem %s1943_s24, 256  ;;  %p1945_p4 = scmp.lt.s32.totalorder %s2284_s27, %s1943_s24 }
  0x85   : > { %p1940_p1 = pnand %p1938_p8, %p1924_p11  ;;  %p1946_p3 = scmp.lt.s32.totalorder %s1944_s16, %s1937_s15 }
  0x87   : > { %p1941_p9 = pneg %p1940_p1  ;;  %p1947_p6 = por %p1946_p3, %p1945_p4 }
  0x89   : > { %p1948_p13 = pnand %p1947_p6, %p1941_p9 }
  0x8b   : > { %1951 = shalt.err (!%p1948_p13)
}
  0x8c   : > { %1719 = dma.hbm_to_vmem [thread:$0]  (!%p2280_p10), %s2276_s28, 128, %s2284_s27, %s240_s29  }
  0x8d   : > { %p2481_p12 = scmp.ne.s32.totalorder %s2472_s26, 0 }
  0x8e   : > { %s2314_s9 = sand.u32 (!%p2481_p12), 1, %s2026_s19  }
  0x8f   : > { %259 = sbr.rel (%p2481_p12) target bundleno = 2289 (0x8f1), region = 40  ;;  %s1545_s7 = sshll.u32 (!%p2481_p12), %s2314_s9, 3 }
  0x90   : > { %s262_s17 = scalar_lea.sflag (!%p2481_p12), [#allocation4], %s2314_s9  ;;  %s265_s8 = scalar_lea.vmem (!%p2481_p12), [#allocation3], %s1545_s7 }
  0x96   : > { %2005 = dma.done.wait (%p2255_p2), %s262_s17, 128  }
  0x97   : > { %2007 = vsyncadd (%p2255_p2), %s262_s17, 4294967168  ;;  %p2482_p4 = scmp.ne.s32.totalorder %s2471_s25, 0 }
  0x99   : > { %2009 = dma.done.wait (%p2482_p4), [#allocation7], 528  }
  0x9a   : > { %2011 = vsyncadd (%p2482_p4), [#allocation7], 4294966768 }
  0x9b   : > { %2013 = dma.done.wait (%p2482_p4), [#allocation10], 528  }
  0x9c   : > { %2015 = vsyncadd (%p2482_p4), [#allocation10], 4294966768  ;;  %v2051_v0 = vmov 0.0|0.0   ;;  %vm2052_vm0 = vmmov 0   ;;  %v2053_v1 = vmov 0.0   ;;  %v313_v2 = vld [vmem:[#allocation6] sm:$0xff] }
  0x9d   : > { %1677 = vmatprep.subr.bf16.mxu0 %v2051_v0  ;;  %1614 = vmatprep.mubr.msk.f32.mxu0 %vm2052_vm0, %v2053_v1  ;;  %v314_v3 = vld [vmem:[#allocation6 + $0x8] sm:$0xff]  ;;  %v315_v4 = vld [vmem:[#allocation6 + $0x10] sm:$0xff]  ;;  %v316_v6 = vld [vmem:[#allocation6 + $0x18] sm:$0xff]  ;;  %vm324_vm1 = vcmask 261120   ;;  %vm398_vm2 = vcmask 64512   ;;  %s2054_s25 = smov 120  }
  0x9e   : > { %1617 = vmatprep.subr.mxu1 %v2053_v1  ;;  %1619 = vmatprep.mubr.msk.f32.mxu1 %vm2052_vm0, %v2053_v1  ;;  %v1678_v5 = vpack.c.bf16 %v314_v3, %v313_v2  ;;  %v1681_v7 = vpack.c.bf16 %v316_v6, %v315_v4  ;;  %v312_v8 = vld [vmem:[%s265_s8] sm:$0xff]  ;;  %v1551_v9 = vld [vmem:[#allocation8] ss:$0 sm:$0xff]  ;;  %s2055_s26 = smov 112   ;;  %v582_v35 = vld [vmem:[#allocation9] sm:$0xff]  ;;  %s2056_s10 = smov 104  }
  0x9f   : > { %v750_v34 = vld [vmem:[#allocation9 + $0x8] sm:$0xff]  ;;  %s1574_s28 = sshll.u32 %s2034_s21, 7  ;;  %s307_s27 = scalar_lea.vmem [#allocation12], %s1545_s7 }
  0xa0   : > { %1679 = vmatpush3.bf16.msra.mxu0 %v1678_v5  ;;  %s1406_s14 = sshll.u32 %s307_s27, 4  ;;  %s2411_s6 = scalar_lea.hbm %s2466_s5, %s1574_s28  ;;  %s2413_s14 = int_to_ptr.vmem [resolvable:$true] %s1406_s14 }
  0xa1   : > { %1680 = vmatprep.subr.bf16.mxu0 %v2051_v0  ;;  %v1064_v0 = vld [vmem:[#allocation9 + $0x10] sm:$0xff]  ;;  %s1392_s24 = scalar_lea.sflag [#allocation5], %s2314_s9  ;;  %s1952_s21 = scalar_lea.vmem %s2413_s14, 128 }
  0xa2   : > { %p1953_p2 = scmp.ne.s32.totalorder %s2413_s14, %s1952_s21  ;;  %p2483_p9 = scmp.ne.s32.totalorder %s2478_s11, 0 }
  0xa3   : > { %s2057_s16 = smov [#allocation12]  }
  0xa4   : > { %1682 = vmatpush3.bf16.msra.mxu0 %v1681_v7  ;;  %p1954_p10 = pnand %p1953_p2, %p2483_p9  ;;  %s1956_s7 = sshll.u32 %s2057_s16, 4  ;;  %s1957_s7 = int_to_ptr.vmem [resolvable:$false] %s1956_s7 }
  0xa5   : > { %1627 = vmatprep.subr.mxu0 %v2053_v1  ;;  %s1958_s17 = scalar_lea.vmem %s1957_s7, 256  ;;  %p1959_p0 = scmp.lt.s32.totalorder %s2413_s14, %s1957_s7 }
  0xa6   : > { %p1955_p11 = pneg %p1954_p10  ;;  %p1960_p7 = scmp.lt.s32.totalorder %s1958_s17, %s1952_s21 }
  0xa7   : > { %1615 = vmatmul.mubr.msk.f32.vlgmr.msra.gmra.mrb[0].mxu0 %vm324_vm1, %v312_v8 }
  0xa8   : > { %1629 = vmatprep.mubr.msk.f32.mxu0 %vm2052_vm0, %v2053_v1  ;;  %p1961_p5 = por %p1960_p7, %p1959_p0 }
  0xaa   : > { %p1962_p8 = pnand %p1961_p5, %p1955_p11 }
 0x17a   : > { %v394_v10 = vpop.f32.mrb[0].mxu0 }
 0x17b   : > { %v2341_v11 = vadd.f32 %v1551_v9, %v394_v10  ;;  %v1616_v12 = vpop.f32.mrb[1].mxu0 }
 0x17d   : > { %399 = vst.msk [vmem:[#allocation2] sm:$0xff] %vm398_vm2, %v2341_v11  ;;  %401 = vrot.lane.b32.xlu0 %v2341_v11, %s2054_s25 }
 0x184   : > { %v417_v13 = vld [vmem:[#allocation2] sm:$0xff] }
 0x185   : > { %1618 = vmatpush3.xpose.msk.msra.mxu1 %vm398_vm2, %v417_v13 }
 0x186   : > { %1622 = vmatprep.subr.mxu1 %v2053_v1 }
 0x188   : > { %1620 = vmatmul.mubr.msk.f32.vlgmr.msra.gmra.mrb[0].mxu1 %vm398_vm2, %v417_v13 }
 0x189   : > { %1623 = vmatpush3.msra.mxu1 %v417_v13  ;;  %1624 = vmatprep.mubr.msk.f32.mxu1 %vm2052_vm0, %v2053_v1 }
 0x18a   : > { %1632 = vmatprep.subr.mxu1 %v2053_v1 }
 0x1ef   : > { %v402_v14 = vpop.permute.xlu0 %401 }
 0x1f0   : > { %405 = vst.msk [vmem:[#allocation2 + $0x8] sm:$0xff] %vm398_vm2, %v402_v14 }
 0x1f7   : > { %v584_v15 = vld [vmem:[#allocation2 + $0x8] sm:$0xff] }
 0x1f8   : > { %1628 = vmatpush3.xpose.msk.msra.mxu0 %vm398_vm2, %v584_v15 }
 0x1f9   : > { %1637 = vmatprep.subr.mxu0 %v2053_v1 }
 0x1fb   : > { %1630 = vmatmul.mubr.msk.f32.vlgmr.msra.gmra.mrb[2].mxu0 %vm398_vm2, %v584_v15 }
 0x1fc   : > { %1639 = vmatprep.mubr.msk.f32.mxu0 %vm2052_vm0, %v2053_v1  ;;  %1638 = vmatpush3.msra.mxu0 %v750_v34 }
 0x1fd   : > { %1647 = vmatprep.subr.mxu0 %v2053_v1 }
 0x25b   : > { %v493_v16 = vpop.f32.mrb[0].mxu1 }
 0x25c   : > { %v497_v17 = vmul.f32 0.35355338, %v493_v16  ;;  %v1621_v18 = vpop.f32.mrb[1].mxu1 }
 0x25d   : > { %v1306_v18 = vld [vmem:[#allocation9 + $0x18] sm:$0xff] }
 0x25e   : > { %v498_v19 = vsel %vm398_vm2, %v497_v17, -inf }
 0x25f   : > { %499 = vmax.xlane.f32.xlu0 %v498_v19 }
 0x2ce   : > { %v660_v20 = vpop.f32.mrb[2].mxu0 }
 0x2cf   : > { %v664_v21 = vmul.f32 0.35355338, %v660_v20  ;;  %v1631_v22 = vpop.f32.mrb[3].mxu0 }
 0x2d1   : > { %v665_v23 = vsel %vm398_vm2, %v664_v21, -inf }
 0x2d2   : > { %666 = vmax.xlane.f32.xlu1 %v665_v23 }
 0x2ec   : > { %v500_v24 = vpop.xlane.xlu0 %499 }
 0x2ed   : > { %v501_v25 = vsub.f32 %v497_v17, %v500_v24 }
 0x2ef   : > { %v502_v26 = vmul.f32 1.442695, %v501_v25  ;;  %v1572_v25 = vld [vmem:[#allocation11] ss:$0 sm:$0xff] }
 0x2f1   : > { %1794 = vpow2.f32 %v502_v26 }
 0x2fb   : > { %v1795_v27 = vpop.eup %1794 }
 0x2fc   : > { %1625 = vmatmul.mubr.msk.f32.vlgmr.msra.gmra.mrb[2].mxu1 %vm398_vm2, %v1795_v27  ;;  %v504_v33 = vsel %vm398_vm2, %v1795_v27, 0.0 }
 0x2fd   : > { %1633 = vmatpush3.msra.mxu1 %v584_v15  ;;  %1634 = vmatprep.mubr.msk.f32.mxu1 %vm2052_vm0, %v2053_v1 }
 0x2fe   : > { %1642 = vmatprep.subr.mxu1 %v2053_v1 }
 0x35f   : > { %v667_v28 = vpop.xlane.xlu1 %666 }
 0x360   : > { %v668_v29 = vsub.f32 %v664_v21, %v667_v28 }
 0x362   : > { %v669_v30 = vmul.f32 1.442695, %v668_v29 }
 0x364   : > { %1796 = vpow2.f32 %v669_v30 }
 0x36e   : > { %v1797_v31 = vpop.eup %1796 }
 0x36f   : > { %1635 = vmatmul.mubr.msk.f32.vlgmr.msra.gmra.mrb[4].mxu1 %vm398_vm2, %v1797_v31  ;;  %v671_v32 = vsel %vm398_vm2, %v1797_v31, 0.0 }
 0x370   : > { %672 = vadd.xlane.f32.xlu1 %v671_v32  ;;  %1644 = vmatprep.mubr.msk.f32.mxu1 %vm2052_vm0, %v2053_v1 }
 0x371   : > { %1643 = vmatpush3.msra.mxu1 %v582_v35 }
 0x372   : > { %1652 = vmatprep.subr.mxu1 %v2053_v1 }
 0x381   : > { %406 = vrot.lane.b32.xlu1 %v2341_v11, %s2055_s26 }
 0x3a5   : > { %505 = vadd.xlane.f32.xlu1 %v504_v33 }
 0x3cf   : > { %v576_v36 = vpop.f32.mrb[2].mxu1 }
 0x3d0   : > { %v1626_v37 = vpop.f32.mrb[3].mxu1 }
 0x3fd   : > { %v673_v38 = vpop.xlane.xlu1 %672 }
 0x401   : > { %v407_v39 = vpop.permute.xlu1 %406 }
 0x402   : > { %410 = vst.msk [vmem:[#allocation2 + $0x10] sm:$0xff] %vm398_vm2, %v407_v39 }
 0x409   : > { %v898_v43 = vld [vmem:[#allocation2 + $0x10] sm:$0xff] }
 0x432   : > { %v506_v40 = vpop.xlane.xlu1 %505 }
 0x433   : > { %1798 = vrcp.f32 %v506_v40 }
 0x434   : > { %1800 = vrcp.f32 %v673_v38 }
 0x43d   : > { %v1799_v41 = vpop.eup %1798 }
 0x43e   : > { %v581_v42 = vmul.f32 %v1799_v41, %v576_v36  ;;  %v1801_v44 = vpop.eup %1800 }
 0x440   : > { %1645 = vmatmul.mubr.msk.f32.vlgmr.msra.gmra.mrb[6].mxu1 %vm398_vm2, %v581_v42 }
 0x441   : > { %1653 = vmatpush3.msra.mxu1 %v898_v43  ;;  %1654 = vmatprep.mubr.msk.f32.mxu1 %vm2052_vm0, %v2053_v1 }
 0x442   : > { %v743_v45 = vpop.f32.mrb[4].mxu1  ;;  %1662 = vmatprep.subr.mxu1 %v2053_v1 }
 0x443   : > { %v748_v46 = vmul.f32 %v1801_v44, %v743_v45  ;;  %v1636_v47 = vpop.f32.mrb[5].mxu1 }
 0x445   : > { %1640 = vmatmul.mubr.msk.f32.vlgmr.msra.gmra.mrb[4].mxu0 %vm398_vm2, %v748_v46 }
 0x446   : > { %1648 = vmatpush3.xpose.msk.msra.mxu0 %vm398_vm2, %v898_v43  ;;  %1649 = vmatprep.mubr.msk.f32.mxu0 %vm2052_vm0, %v2053_v1 }
 0x447   : > { %1657 = vmatprep.subr.mxu0 %v2053_v1 }
 0x449   : > { %1650 = vmatmul.mubr.msk.f32.vlgmr.msra.gmra.mrb[6].mxu0 %vm398_vm2, %v898_v43 }
 0x44a   : > { %1659 = vmatprep.mubr.msk.f32.mxu0 %vm2052_vm0, %v2053_v1  ;;  %1658 = vmatpush3.msra.mxu0 %v1064_v0 }
 0x44b   : > { %1667 = vmatprep.subr.mxu0 %v2053_v1 }
 0x513   : > { %v893_v48 = vpop.f32.mrb[6].mxu1 }
 0x514   : > { %v1646_v49 = vpop.f32.mrb[7].mxu1 }
 0x518   : > { %v820_v50 = vpop.f32.mrb[4].mxu0 }
 0x519   : > { %v894_v51 = vadd.f32 %v893_v48, %v820_v50  ;;  %v1641_v52 = vpop.f32.mrb[5].mxu0 }
 0x51c   : > { %v974_v53 = vpop.f32.mrb[6].mxu0 }
 0x51d   : > { %v978_v54 = vmul.f32 0.35355338, %v974_v53  ;;  %v1651_v55 = vpop.f32.mrb[7].mxu0 }
 0x51f   : > { %v979_v56 = vsel %vm398_vm2, %v978_v54, -inf }
 0x520   : > { %980 = vmax.xlane.f32.xlu0 %v979_v56 }
 0x536   : > { %411 = vrot.lane.b32.xlu0 %v2341_v11, %s2056_s10 }
 0x5ad   : > { %v981_v57 = vpop.xlane.xlu0 %980 }
 0x5ae   : > { %v982_v58 = vsub.f32 %v978_v54, %v981_v57 }
 0x5b0   : > { %v983_v59 = vmul.f32 1.442695, %v982_v58 }
 0x5b1   : > { %v412_v60 = vpop.permute.xlu0 %411 }
 0x5b2   : > { %1802 = vpow2.f32 %v983_v59  ;;  %415 = vst.msk [vmem:[#allocation2 + $0x18] sm:$0xff] %vm398_vm2, %v412_v60 }
 0x5b9   : > { %v1140_v62 = vld [vmem:[#allocation2 + $0x18] sm:$0xff] }
 0x5bc   : > { %v1803_v61 = vpop.eup %1802 }
 0x5bd   : > { %1655 = vmatmul.mubr.msk.f32.vlgmr.msra.gmra.mrb[8].mxu1 %vm398_vm2, %v1803_v61  ;;  %v985_v63 = vsel %vm398_vm2, %v1803_v61, 0.0 }
 0x5be   : > { %1663 = vmatpush3.xpose.msk.msra.mxu1 %vm398_vm2, %v1140_v62  ;;  %986 = vadd.xlane.f32.xlu0 %v985_v63 }
 0x5bf   : > { %1664 = vmatprep.mubr.msk.f32.mxu1 %vm2052_vm0, %v2053_v1  ;;  %1672 = vmatprep.subr.mxu1 %v2053_v1 }
 0x5c1   : > { %1665 = vmatmul.mubr.msk.f32.vlgmr.msra.gmra.mrb[10].mxu1 %vm398_vm2, %v1140_v62 }
 0x5c2   : > { %1674 = vmatprep.mubr.msk.f32.mxu1 %vm2052_vm0, %v2053_v1  ;;  %1673 = vmatpush3.msra.mxu1 %v1306_v18 }
 0x64b   : > { %v987_v2 = vpop.xlane.xlu0 %986 }
 0x64c   : > { %1804 = vrcp.f32 %v987_v2 }
 0x656   : > { %v1805_v3 = vpop.eup %1804 }
 0x690   : > { %v1057_v4 = vpop.f32.mrb[8].mxu1 }
 0x691   : > { %v1062_v5 = vmul.f32 %v1805_v3, %v1057_v4  ;;  %v1656_v6 = vpop.f32.mrb[9].mxu1 }
 0x693   : > { %1660 = vmatmul.mubr.msk.f32.vlgmr.msra.gmra.mrb[8].mxu0 %vm398_vm2, %v1062_v5 }
 0x694   : > { %1668 = vmatpush3.msra.mxu0 %v1140_v62  ;;  %v1216_v7 = vpop.f32.mrb[10].mxu1  ;;  %1669 = vmatprep.mubr.msk.f32.mxu0 %vm2052_vm0, %v2053_v1 }
 0x695   : > { %v1220_v8 = vmul.f32 0.35355338, %v1216_v7  ;;  %v1666_v9 = vpop.f32.mrb[11].mxu1 }
 0x697   : > { %v1221_v10 = vsel %vm398_vm2, %v1220_v8, -inf }
 0x698   : > { %1222 = vmax.xlane.f32.xlu1 %v1221_v10 }
 0x725   : > { %v1223_v11 = vpop.xlane.xlu1 %1222 }
 0x726   : > { %v1224_v12 = vsub.f32 %v1220_v8, %v1223_v11 }
 0x728   : > { %v1225_v13 = vmul.f32 1.442695, %v1224_v12 }
 0x72a   : > { %1806 = vpow2.f32 %v1225_v13 }
 0x734   : > { %v1807_v14 = vpop.eup %1806 }
 0x735   : > { %1670 = vmatmul.mubr.msk.f32.vlgmr.msra.gmra.mrb[10].mxu0 %vm398_vm2, %v1807_v14  ;;  %v1227_v15 = vsel %vm398_vm2, %v1807_v14, 0.0 }
 0x736   : > { %1228 = vadd.xlane.f32.xlu1 %v1227_v15 }
 0x766   : > { %v1134_v16 = vpop.f32.mrb[8].mxu0 }
 0x767   : > { %v1138_v17 = vadd.f32 %v1134_v16, %v894_v51  ;;  %v1661_v1 = vpop.f32.mrb[9].mxu0 }
 0x7c3   : > { %v1229_v19 = vpop.xlane.xlu1 %1228 }
 0x7c4   : > { %1808 = vrcp.f32 %v1229_v19 }
 0x7ce   : > { %v1809_v20 = vpop.eup %1808 }
 0x808   : > { %v1299_v21 = vpop.f32.mrb[10].mxu0 }
 0x809   : > { %v1304_v22 = vmul.f32 %v1809_v20, %v1299_v21  ;;  %v1671_v23 = vpop.f32.mrb[11].mxu0 }
 0x80b   : > { %1675 = vmatmul.mubr.msk.f32.vlgmr.msra.gmra.mrb[12].mxu1 %vm398_vm2, %v1304_v22 }
 0x8de   : > { %v1376_v24 = vpop.f32.mrb[12].mxu1 }
 0x8df   : > { %v1380_v26 = vadd.f32 %v1376_v24, %v1138_v17  ;;  %v1676_v27 = vpop.f32.mrb[13].mxu1 }
 0x8e1   : > { %v1388_v28 = vadd.f32 %v1572_v25, %v1380_v26 }
 0x8e3   : > { %1390 = vst.msk [vmem:[%s307_s27] sm:$0xff] %vm324_vm1, %v1388_v28 }
 0x8e4   : > { %1965 = shalt.err (!%p1962_p8)
}
 0x8e5   : > { %s1966_s9 = scalar_lea.hbm %s2411_s6, 128  ;;  %s1970_s26 = scalar_lea.hbm %s2466_s5, 256 }
 0x8e6   : > { %p1967_p1 = scmp.ne.s32.totalorder %s2411_s6, %s1966_s9  ;;  %p1971_p13 = scmp.lt.u32.totalorder %s2411_s6, %s2466_s5 }
 0x8e7   : > { %p1972_p12 = scmp.lt.u32.totalorder %s1970_s26, %s1966_s9  ;;  %p1974_p2 = scmp.lt.u32.totalorder %s1966_s9, %s2411_s6 }
 0x8e8   : > { %p1968_p3 = pnand %p1967_p1, %p2483_p9 }
 0x8e9   : > { %p1973_p4 = por %p1972_p12, %p1971_p13 }
 0x8ea   : > { %p1969_p6 = pneg %p1968_p3 }
 0x8eb   : > { %p1975_p10 = por %p1974_p2, %p1973_p4 }
 0x8ed   : > { %p1976_p11 = pnand %p1975_p10, %p1969_p6 }
 0x8ef   : > { %1979 = shalt.err (!%p1976_p11)
}
 0x8f0   : > { %1701 = dma.vmem_to_hbm [thread:$0]  (%p2483_p9), %s2413_s14, 128, %s2411_s6, %s1392_s24  }
 0x8f1 PF: > { %s1418_s27 = sand.u32 1, %s2022_s18   ;;  %p2484_p0 = scmp.ne.s32.totalorder %s2479_s13, 0 }
 0x8f2   : > { %p2485_p7 = scmp.ge.s32.totalorder %s2042_s23, 2  ;;  %s1419_s29 = scalar_lea.sflag [#allocation5], %s1418_s27 }
 0x8f4   : > { %p1721_p5 = pnand %p2485_p7, %p2484_p0 }
 0x8f6   : > { %2017 = dma.done.wait (!%p1721_p5), %s1419_s29, 128  }
 0x8f7   : > { %2019 = vsyncadd (!%p1721_p5), %s1419_s29, 4294967168  ;;  %s23_s23 = sadd.s32 1, %s2042_s23   ;;  %s2486_s18 = smov %s2026_s19 }
 0x8f8   : > { %p20_p8 = scmp.ge.s32.totalorder %s23_s23, 4   ;;  %s2487_s19 = smov %s2030_s20 }
 0x8f9   : > { %s2488_s20 = smov %s2264_s12  ;;  %s2489_s21 = smov %s2038_s22 }
 0x8fa   : > { %s2490_s22 = smov %s2492_s30  ;;  %22 = sbr.rel (!%p20_p8) target bundleno = 8 (0x8), region = 118 }
 0x901   :  { %1424 = vsyncpa [#allocation4], 1 }
 0x902   :  { %1426 = vsyncpa [#allocation4 + $0x1], 1 }
 0x903   :  { %1427 = vsyncpa [#allocation7], 1 }
 0x904   :  { %1428 = vsyncpa [#allocation10], 1 }
 0x905   :  { %1429 = vsyncpa [#allocation5], 1 }
 0x906   :  { %1431 = vsyncpa [#allocation5 + $0x1], 1 }

</bundles_post_ra>
